<compile_context>
chip_gen: v6e
topology: v6e:2x2x1
jax: 0.10.0
libtpu: 0.0.40
codegen_flags: <defaults>
</compile_context>

<pallas_src>
import math

import jax
import jax.numpy as jnp
import numpy as np
from jax.experimental import pallas as pl
from jax.experimental.pallas import tpu as pltpu

BN_EPS = 1e-5
_LANES = 128


def _round_up(x, m):
    return (x + m - 1) // m * m


# ---------- Kernel 1: conv-as-matmul (lane-dense output) + per-tile BN partials ----------
def _make_conv_stats_kernel(tm, fuse_relu):
    n_chunks = tm // _LANES

    def kernel(w_ref, a_ref, y_ref, psum_ref, psq_ref):
        # (C_out, K_pad) @ (K_pad, tm) -> (C_out, tm): M on the 128-lane axis.
        y = jnp.dot(w_ref[...], a_ref[...], preferred_element_type=jnp.float32)

        # Per-tile partial BN statistics folded into lane-aligned (C_out, 128)
        # chunks (static 128-wide slices only; no cross-lane reduce/relayout).
        ps = y[:, 0:_LANES]
        pq = ps * ps
        for j in range(1, n_chunks):
            blk = y[:, j * _LANES:(j + 1) * _LANES]
            ps = ps + blk
            pq = pq + blk * blk
        psum_ref[...] = ps[None, :, :]
        psq_ref[...] = pq[None, :, :]

        if fuse_relu:                      # only when BN is disabled
            y = jnp.maximum(y, 0.0)
        y_ref[...] = y

    return kernel


# ---------- Kernel 2: precomputed BN affine + ReLU (pure FMA + max) -----------------------
def _make_bn_relu_kernel(use_relu):
    def kernel(y_ref, scale_ref, shift_ref, o_ref):
        y = y_ref[...] * scale_ref[...] + shift_ref[...]
        if use_relu:
            y = jnp.maximum(y, 0.0)
        o_ref[...] = y

    return kernel


def conv_br_pallas(x, weight, gamma, beta, stride, padding,
                   use_bn=True, use_relu=True, tm=512):
    """x: (N, C_in, D, H, W) f32; weight: (C_out, C_in, kd, kh, kw) f32."""
    N, C_in, D, H, W = x.shape
    C_out, _, kd, kh, kw = weight.shape
    s, p = stride, padding

    Do = (D + 2 * p - kd) // s + 1
    Ho = (H + 2 * p - kh) // s + 1
    Wo = (W + 2 * p - kw) // s + 1

    K = C_in * kd * kh * kw
    M = N * Do * Ho * Wo
    K_pad = _round_up(K, _LANES)                 # aligned contraction dim
    tm_eff = min(tm, _round_up(M, _LANES))       # lane-dense M tile (mult of 128)
    M_pad = _round_up(M, tm_eff)                 # zero-pad M; padded cols are 0
    num_tiles = M_pad // tm_eff

    # -------- glue: im2col in bf16, transposed so M lands on the lane axis --------
    # TODO(synk): for production shapes move the im2col into the kernel (K-tap
    # reduction grid axis over strided windows of the padded input) so the
    # kd*kh*kw-times-inflated patch matrix never hits HBM.
    xb = x.astype(jnp.bfloat16)
    xp = jnp.pad(xb, ((0, 0), (0, 0), (p, p), (p, p), (p, p)))
    patches = []
    for a in range(kd):
        for b in range(kh):
            for c in range(kw):
                patches.append(
                    xp[:, :, a:a + s * Do:s, b:b + s * Ho:s, c:c + s * Wo:s])
    # (N, C_in, taps, Do, Ho, Wo) -> (C_in, taps, N, Do, Ho, Wo) -> (K, M)
    a_t = jnp.stack(patches, axis=2).transpose(1, 2, 0, 3, 4, 5).reshape(K, M)
    a_t = jnp.pad(a_t, ((0, K_pad - K), (0, M_pad - M)))
    w_m = jnp.pad(weight.astype(jnp.bfloat16).reshape(C_out, K),
                  ((0, 0), (0, K_pad - K)))

    # VMEM budget: double-buffered tiles with headroom, capped at 32 MiB so it
    # is safe on v5e (16 MiB scoped default), v6e and v7x (64 MiB physical).
    tile_bytes = 2 * (K_pad * tm_eff * 2 + C_out * K_pad * 2
                      + C_out * tm_eff * 4 + 2 * C_out * _LANES * 4)
    vmem_limit = int(min(max(4 * tile_bytes, 16 * 1024 * 1024),
                         32 * 1024 * 1024))

    # -------- Pallas call 1: tiled matmul + per-tile BN partial stats --------
    conv_t, psum, psq = pl.pallas_call(
        _make_conv_stats_kernel(tm_eff, fuse_relu=(use_relu and not use_bn)),
        out_shape=(
            jax.ShapeDtypeStruct((C_out, M_pad), jnp.float32),
            jax.ShapeDtypeStruct((num_tiles, C_out, _LANES), jnp.float32),
            jax.ShapeDtypeStruct((num_tiles, C_out, _LANES), jnp.float32),
        ),
        grid=(num_tiles,),
        in_specs=[
            pl.BlockSpec((C_out, K_pad), lambda i: (0, 0)),      # resident weight
            pl.BlockSpec((K_pad, tm_eff), lambda i: (0, i)),     # patch tile
        ],
        out_specs=[
            pl.BlockSpec((C_out, tm_eff), lambda i: (0, i)),     # lane-dense
            pl.BlockSpec((1, C_out, _LANES), lambda i: (i, 0, 0)),
            pl.BlockSpec((1, C_out, _LANES), lambda i: (i, 0, 0)),
        ],
        compiler_params=pltpu.CompilerParams(
            dimension_semantics=("parallel",),      # per-tile partials -> no race
            vmem_limit_bytes=vmem_limit),
    )(w_m, a_t)

    if not use_bn:
        out_t = conv_t                  # ReLU (if requested) already fused
    else:
        # Tiny per-channel reduction + BN affine, computed once (not per tile).
        cnt = float(M)                  # padded M columns are zero -> contribute 0
        ch_sum = jnp.sum(psum, axis=(0, 2))
        ch_sq = jnp.sum(psq, axis=(0, 2))
        mean = ch_sum / cnt
        # TODO(synk): for very large M a two-pass / Welford variance is safer
        # than E[y^2]-E[y]^2; the clamp guards tiny negative rounding.
        var = jnp.maximum(ch_sq / cnt - mean * mean, 0.0)
        scale = gamma.astype(jnp.float32) * jax.lax.rsqrt(var + BN_EPS)
        shift = beta.astype(jnp.float32) - mean * scale
        scale2 = scale.reshape(C_out, 1)
        shift2 = shift.reshape(C_out, 1)

        # -------- Pallas call 2: y*scale + shift, ReLU --------
        out_t = pl.pallas_call(
            _make_bn_relu_kernel(use_relu),
            out_shape=jax.ShapeDtypeStruct((C_out, M_pad), jnp.float32),
            grid=(num_tiles,),
            in_specs=[
                pl.BlockSpec((C_out, tm_eff), lambda i: (0, i)),
                pl.BlockSpec((C_out, 1), lambda i: (0, 0)),
                pl.BlockSpec((C_out, 1), lambda i: (0, 0)),
            ],
            out_specs=pl.BlockSpec((C_out, tm_eff), lambda i: (0, i)),
            compiler_params=pltpu.CompilerParams(
                dimension_semantics=("parallel",),
                vmem_limit_bytes=vmem_limit),
        )(conv_t, scale2, shift2)

    # glue: back to NCDHW
    out = out_t[:, :M].reshape(C_out, N, Do, Ho, Wo).transpose(1, 0, 2, 3, 4)
    return out


# TODO(synk): BatchNorm running_mean/running_var buffer updates (training-time
# bookkeeping) are not modeled; they do not affect the forward output.


def _reference(x, weight, gamma, beta, stride, padding):
    y = jax.lax.conv_general_dilated(
        x, weight, window_strides=(stride,) * 3,
        padding=[(padding, padding)] * 3,
        dimension_numbers=("NCDHW", "OIDHW", "NCDHW"))
    mean = y.mean(axis=(0, 2, 3, 4), keepdims=True)
    var = y.var(axis=(0, 2, 3, 4), keepdims=True)
    g = gamma.reshape(1, -1, 1, 1, 1)
    b = beta.reshape(1, -1, 1, 1, 1)
    y = (y - mean) * jax.lax.rsqrt(var + BN_EPS) * g + b
    return jnp.maximum(y, 0.0)


if __name__ == "__main__":
    # Module config: ConvBR(C_in=4, C_out=8, kernel_size=3, stride=1, padding=1)
    N, C_in, C_out = 2, 4, 8
    D = H = W = 8
    ksize, stride, padding = 3, 1, 1

    key = jax.random.PRNGKey(0)
    kx, kw = jax.random.split(key)

    x = jax.random.normal(kx, (N, C_in, D, H, W), dtype=jnp.float32)

    # Kaiming normal, mode='fan_out', nonlinearity='relu':
    fan_out = C_out * ksize * ksize * ksize
    std = math.sqrt(2.0 / fan_out)
    weight = std * jax.random.normal(
        kw, (C_out, C_in, ksize, ksize, ksize), dtype=jnp.float32)

    gamma = jnp.ones((C_out,), dtype=jnp.float32)   # BN weight init constant 1
    beta = jnp.zeros((C_out,), dtype=jnp.float32)   # BN bias init constant 0

    out = conv_br_pallas(x, weight, gamma, beta, stride, padding)
    out = jax.block_until_ready(out)

    ref = _reference(x, weight, gamma, beta, stride, padding)
    # bf16 MXU inputs (f32 accumulation): slightly looser atol than pure f32.
    np.testing.assert_allclose(np.asarray(out), np.asarray(ref),
                               rtol=2e-2, atol=2e-2)

    print("KERNEL_OK")
</pallas_src>

<mosaic_0001>
module attributes {stable_mosaic.version = 11 : i64} {
  func.func @kernel(%arg0: i32, %arg1: memref<8x128xbf16, #tpu.memory_space<vmem>>, %arg2: memref<128x512xbf16, #tpu.memory_space<vmem>>, %arg3: memref<8x512xf32, #tpu.memory_space<vmem>>, %arg4: memref<1x8x128xf32, #tpu.memory_space<vmem>>, %arg5: memref<1x8x128xf32, #tpu.memory_space<vmem>>) attributes {dimension_semantics = [#tpu.dimension_semantics<parallel>], iteration_bounds = array<i64: 2>, scalar_prefetch = 0 : i64, scratch_operands = 0 : i64, tpu.core_type = #tpu.core_type<tc>, window_params = [{pipeline_mode = #tpu.pipeline_mode<synchronous>, transform_indices = @transform_0, window_bounds = array<i64: 8, 128>}, {transform_indices = @transform_1, window_bounds = array<i64: 128, 512>}, {transform_indices = @transform_2, window_bounds = array<i64: 8, 512>}, {transform_indices = @transform_3, window_bounds = array<i64: 1, 8, 128>}, {transform_indices = @transform_4, window_bounds = array<i64: 1, 8, 128>}]} {
    %c0 = arith.constant 0 : index
    %c0_0 = arith.constant 0 : index
    %0 = vector.load %arg1[%c0, %c0_0] : memref<8x128xbf16, #tpu.memory_space<vmem>>, vector<8x128xbf16>
    %c0_1 = arith.constant 0 : index
    %c0_2 = arith.constant 0 : index
    %1 = vector.load %arg2[%c0_1, %c0_2] : memref<128x512xbf16, #tpu.memory_space<vmem>>, vector<128x512xbf16>
    %cst = arith.constant dense<0.000000e+00> : vector<8x512xf32>
    %2 = tpu.matmul %0, %1, %cst {dimension_numbers = #tpu.dot_dimension_numbers<[1], [0], [0], [1], [0, 0, 1, 1], [], []>} : vector<8x128xbf16>, vector<128x512xbf16>, vector<8x512xf32> -> vector<8x512xf32>
    %3 = vector.extract_strided_slice %2 {offsets = [0, 0], sizes = [8, 128], strides = [1, 1]} : vector<8x512xf32> to vector<8x128xf32>
    %4 = arith.mulf %3, %3 : vector<8x128xf32>
    %5 = vector.extract_strided_slice %2 {offsets = [0, 128], sizes = [8, 128], strides = [1, 1]} : vector<8x512xf32> to vector<8x128xf32>
    %6 = arith.addf %3, %5 : vector<8x128xf32>
    %7 = arith.mulf %5, %5 : vector<8x128xf32>
    %8 = arith.addf %4, %7 : vector<8x128xf32>
    %9 = vector.extract_strided_slice %2 {offsets = [0, 256], sizes = [8, 128], strides = [1, 1]} : vector<8x512xf32> to vector<8x128xf32>
    %10 = arith.addf %6, %9 : vector<8x128xf32>
    %11 = arith.mulf %9, %9 : vector<8x128xf32>
    %12 = arith.addf %8, %11 : vector<8x128xf32>
    %13 = vector.extract_strided_slice %2 {offsets = [0, 384], sizes = [8, 128], strides = [1, 1]} : vector<8x512xf32> to vector<8x128xf32>
    %14 = arith.addf %10, %13 : vector<8x128xf32>
    %15 = arith.mulf %13, %13 : vector<8x128xf32>
    %16 = arith.addf %12, %15 : vector<8x128xf32>
    %17 = vector.shape_cast %14 : vector<8x128xf32> to vector<1x8x128xf32>
    %c0_3 = arith.constant 0 : index
    %c0_4 = arith.constant 0 : index
    %c0_5 = arith.constant 0 : index
    %18 = vector.load %arg4[%c0_3, %c0_4, %c0_5] : memref<1x8x128xf32, #tpu.memory_space<vmem>>, vector<1x8x128xf32>
    tpu.vector_store %arg4[%c0_3, %c0_4, %c0_5], %17 {strides = array<i32>} : memref<1x8x128xf32, #tpu.memory_space<vmem>>, vector<1x8x128xf32>,
    %19 = vector.shape_cast %16 : vector<8x128xf32> to vector<1x8x128xf32>
    %c0_6 = arith.constant 0 : index
    %c0_7 = arith.constant 0 : index
    %c0_8 = arith.constant 0 : index
    %20 = vector.load %arg5[%c0_6, %c0_7, %c0_8] : memref<1x8x128xf32, #tpu.memory_space<vmem>>, vector<1x8x128xf32>
    tpu.vector_store %arg5[%c0_6, %c0_7, %c0_8], %19 {strides = array<i32>} : memref<1x8x128xf32, #tpu.memory_space<vmem>>, vector<1x8x128xf32>,
    %c0_9 = arith.constant 0 : index
    %c0_10 = arith.constant 0 : index
    %21 = vector.load %arg3[%c0_9, %c0_10] : memref<8x512xf32, #tpu.memory_space<vmem>>, vector<8x512xf32>
    tpu.vector_store %arg3[%c0_9, %c0_10], %2 {strides = array<i32>} : memref<8x512xf32, #tpu.memory_space<vmem>>, vector<8x512xf32>,
    return
  }
  func.func @transform_0(%arg0: i32) -> (i32, i32) {
    %c0_i32 = arith.constant 0 : i32
    %c0_i32_0 = arith.constant 0 : i32
    %c0_i32_1 = arith.constant 0 : i32
    return %c0_i32, %c0_i32_0 : i32, i32
  }
  func.func @transform_1(%arg0: i32) -> (i32, i32) {
    %c0_i32 = arith.constant 0 : i32
    %c0_i32_0 = arith.constant 0 : i32
    return %c0_i32, %arg0 : i32, i32
  }
  func.func @transform_2(%arg0: i32) -> (i32, i32) {
    %c0_i32 = arith.constant 0 : i32
    %c0_i32_0 = arith.constant 0 : i32
    return %c0_i32, %arg0 : i32, i32
  }
  func.func @transform_3(%arg0: i32) -> (i32, i32, i32) {
    %c0_i32 = arith.constant 0 : i32
    %c0_i32_0 = arith.constant 0 : i32
    %c0_i32_1 = arith.constant 0 : i32
    return %arg0, %c0_i32, %c0_i32_0 : i32, i32, i32
  }
  func.func @transform_4(%arg0: i32) -> (i32, i32, i32) {
    %c0_i32 = arith.constant 0 : i32
    %c0_i32_0 = arith.constant 0 : i32
    %c0_i32_1 = arith.constant 0 : i32
    return %arg0, %c0_i32, %c0_i32_0 : i32, i32, i32
  }
}

</mosaic_0001>

<bundles_post_ra>
// kernel: tpu_custom_call.1
= control target key start
LH: loop header
LB: loop body
LE: loop exit
PB: predicated region body
PF: predicated region fallthrough
CT: control target
= control target key end

     0   :  { %10 = vsyncpa [#allocation3], 0  ;;  %s1423_s0 = inlined_call_operand.hbm [shape: bf16[8,128], index: 0, kind: input, shape index: {}]   ;;  %s1424_s1 = inlined_call_operand.hbm [shape: bf16[128,1024], index: 1, kind: input, shape index: {}]   ;;  %s1425_s2 = inlined_call_operand.hbm [shape: f32[8,1024], index: 2, kind: output, shape index: {0}]   ;;  %s1426_s3 = inlined_call_operand.hbm [shape: f32[2,8,128], index: 3, kind: output, shape index: {1}]   ;;  %s1427_s4 = inlined_call_operand.hbm [shape: f32[2,8,128], index: 4, kind: output, shape index: {2}]  }
   0x1   :  { %11 = vsyncpa [#allocation6], 0 }
   0x2   :  { %13 = vsyncpa [#allocation6 + $0x1], 0 }
   0x3   :  { %14 = vsyncpa [#allocation4], 0 }
   0x4   :  { %16 = vsyncpa [#allocation4 + $0x1], 0 }
   0x5   :  { %17 = vsyncpa [#allocation9], 0 }
   0x6   :  { %19 = vsyncpa [#allocation9 + $0x1], 0  ;;  %s1124_s15 = smov 0   ;;  %s1126_s16 = smov 0  }
   0x7   :  { %s1128_s17 = smov 0   ;;  %s1130_s18 = smov 0  }
   0x8 LB: > { %s1145_s19 = sadd.s32 4294967295, %s1088_s18   ;;  %s1432_s20 = sadd.s32 4294967294, %s1088_s18   ;;  %s1088_s18 = sphi %s1130_s18, %s1453_s18   ;;  %s1084_s17 = sphi %s1128_s17, %s1452_s17   ;;  %s1080_s16 = sphi %s1126_s16, %s1451_s16   ;;  %s1076_s15 = sphi %s1124_s15, %s1450_s15  }
   0x9   : > { %s1149_s21 = sadd.s32 1, %s1088_s18   ;;  %s53_s22 = sadd.s32 1, %s1084_s17 }
   0xa   : > { %s50_s23 = ssub.s32 %s1088_s18, %s1149_s21  ;;  %p60_p0 = scmp.ne.s32.totalorder %s1084_s17, %s1080_s16 }
   0xb   : > { %p51_p1 = scmp.eq.s32.totalorder %s50_s23, 0  ;;  %p61_p2 = scmp.eq.s32.totalorder %s1088_s18, 0 }
   0xc   : > { %p66_p3 = scmp.ne.s32.totalorder %s1080_s16, %s1076_s15  ;;  %p1428_p4 = scmp.eq.s32.totalorder %s1145_s19, 0 }
   0xd   : > { %s1161_s24 = scalar_select %p51_p1, %s1084_s17, %s53_s22  }
   0xe   : > { %p1163_p5 = por %p61_p2, %p60_p0  ;;  %p1169_p6 = por %p1428_p4, %p66_p3 }
   0xf   : > { %p90_p7 = scmp.eq.s32.totalorder %s1145_s19, 1  ;;  %p96_p8 = scmp.eq.s32.totalorder %s1432_s20, 1 }
  0x10   : > { %s1434_s26 = scalar_select %p1169_p6, 1, 0 }
  0x11   : > { %p736_p9 = scmp.ge.s32.totalorder %s1088_s18, 1  ;;  %p155_p10 = scmp.lt.s32.totalorder %s1088_s18, 3 }
  0x12   : > { %p1178_p11 = por %p90_p7, %p60_p0  ;;  %p1182_p12 = por %p96_p8, %p66_p3 }
  0x13   : > { %p1186_p13 = pnand %p736_p9, %p155_p10  ;;  %s1090_s30 = smov [#allocation2]  }
  0x14   : > { %s1435_s27 = scalar_select %p1178_p11, 1, 0 }
  0x15   : > { %s1436_s28 = scalar_select %p1182_p12, 1, 0 }
  0x16   : > { %s1437_s29 = scalar_select %p1186_p13, 1, 0 }
  0x17   : > { %p803_p2 = pneg %p1186_p13  ;;  %s168_s5 = sshll.u32 %s1090_s30, 4  ;;  %s169_s5 = int_to_ptr.vmem [resolvable:$true] %s168_s5 }
  0x18   : > { %p822_p4 = scmp.lt.s32.totalorder %s1088_s18, 2  ;;  %p1438_p0 = scmp.eq.s32.totalorder %s1145_s19, 0 }
  0x19   : > { %s179_s7 = sand.u32 1, %s1084_s17   ;;  %s921_s10 = scalar_lea.vmem %s169_s5, 64 }
  0x1a   : > { %p1196_p7 = pnand %p803_p2, %p1438_p0  ;;  %p1203_p3 = pnand %p822_p4, %p1163_p5 }
  0x1b   : > { %s739_s9 = sshll.u32 %s179_s7, 8  ;;  %p922_p9 = scmp.ne.s32.totalorder %s169_s5, %s921_s10 }
  0x1c   : > { %p912_p8 = pneg %p1196_p7  ;;  %p929_p12 = scmp.lt.s32.totalorder %s169_s5, %s169_s5 }
  0x1d   : > { %p930_p11 = scmp.lt.s32.totalorder %s921_s10, %s921_s10 }
  0x1e   : > { %p924_p10 = pnand %p922_p9, %p912_p8 }
  0x1f   : > { %p931_p2 = por %p930_p11, %p929_p12 }
  0x20   : > { %p925_p1 = pneg %p924_p10 }
  0x22   : > { %p932_p0 = pnand %p931_p2, %p925_p1 }
  0x24   : > { %935 = shalt.err (!%p932_p0)
}
  0x25   : > { %806 = dma.hbm_to_vmem [thread:$0]  (!%p1196_p7), %s1423_s0, 64, %s169_s5, [#allocation3]  }
  0x26   : > { %s789_s13 = sshll.u32 %s1088_s18, 8  ;;  %s183_s14 = scalar_lea.vmem [#allocation5], %s739_s9 }
  0x27   : > { %s190_s22 = sshll.u32 %s183_s14, 4  ;;  %s1218_s30 = scalar_lea.hbm %s1424_s1, %s789_s13  ;;  %s1220_s22 = int_to_ptr.vmem [resolvable:$true] %s190_s22 }
  0x28   : > { %s1222_s6 = scalar_lea.sflag [#allocation6], %s179_s7  ;;  %s936_s10 = scalar_lea.hbm %s1218_s30, 4096 }
  0x29   : > { %p937_p4 = scmp.ne.s32.totalorder %s1218_s30, %s936_s10  ;;  %p938_p5 = pneg %p1203_p3 }
  0x2a   : > { %s941_s11 = scalar_lea.hbm %s1424_s1, 8192  ;;  %p942_p1 = scmp.lt.s32.totalorder %s1218_s30, %s1424_s1 }
  0x2b   : > { %p939_p11 = pnand %p938_p5, %p937_p4  ;;  %p943_p7 = scmp.lt.s32.totalorder %s941_s11, %s936_s10 }
  0x2d   : > { %p940_p12 = pneg %p939_p11  ;;  %p944_p8 = por %p943_p7, %p942_p1 }
  0x2f   : > { %p945_p9 = pnand %p944_p8, %p940_p12 }
  0x31   : > { %948 = shalt.err (!%p945_p9)
}
  0x32   : > { %s949_s7 = scalar_lea.vmem %s1220_s22, 4096  ;;  %s1091_s14 = smov [#allocation5]  }
  0x33   : > { %p950_p10 = scmp.ne.s32.totalorder %s1220_s22, %s949_s7  ;;  %s954_s23 = sshll.u32 %s1091_s14, 4  ;;  %s955_s23 = int_to_ptr.vmem [resolvable:$false] %s954_s23 }
  0x34   : > { %s956_s25 = scalar_lea.vmem %s955_s23, 8192  ;;  %p957_p4 = scmp.lt.s32.totalorder %s1220_s22, %s955_s23 }
  0x35   : > { %p952_p2 = pnand %p950_p10, %p938_p5  ;;  %p958_p11 = scmp.lt.s32.totalorder %s956_s25, %s949_s7 }
  0x37   : > { %p953_p0 = pneg %p952_p2  ;;  %p959_p6 = por %p958_p11, %p957_p4 }
  0x39   : > { %p960_p13 = pnand %p959_p6, %p953_p0 }
  0x3b   : > { %963 = shalt.err (!%p960_p13)
}
  0x3c   : > { %s1092_s10 = smov 512   ;;  %s1093_s5 = smov 256  }
  0x3d   : > { %s1094_s9 = smov 16   ;;  %p1441_p5 = scmp.ne.s32.totalorder %s1437_s29, 0 }
  0x3e   : > { %810 = dma.hbm_to_vmem [thread:$0]  (!%p1203_p3), %s1218_s30, 4096, %s1220_s22, %s1222_s6, %s1092_s10, %s1093_s5, %s1094_s9  }
  0x3f   : > { %202 = sbr.rel (%p1441_p5) target bundleno = 362 (0x16a), region = 28  ;;  %p1442_p12 = scmp.eq.s32.totalorder (!%p1441_p5), %s1145_s19, 0 }
  0x44   : > { %1059 = dma.done.wait (%p1442_p12), [#allocation3], 64   ;;  %p1443_p1 = pmov %p1442_p12 }
  0x45   : > { %s1250_s11 = sand.u32 1, %s1080_s16   ;;  %p1444_p6 = scmp.ne.s32.totalorder %s1434_s26, 0 }
  0x46   : > { %1061 = vsyncadd (%p1443_p1), [#allocation3], 4294967232  ;;  %s744_s12 = sshll.u32 %s1250_s11, 8  ;;  %s209_s13 = scalar_lea.sflag [#allocation6], %s1250_s11 }
  0x47   : > { %s1254_s7 = scalar_lea.vmem [#allocation5], %s744_s12 }
  0x48   : > { %1063 = dma.done.wait (%p1444_p6), %s209_s13, 4096  }
  0x49   : > { %1065 = vsyncadd (%p1444_p6), %s209_s13, 4294963200  ;;  %v1095_v0 = vmov 0   ;;  %v862_v1 = vld [vmem:[%s1254_s7 + $0xe4] ss:$16 sps:$4 sm:$0xff]   ;;  %v864_v2 = vld [vmem:[%s1254_s7 + $0xec] ss:$16 sps:$4 sm:$0xff]  }
  0x4a   : > { %475 = vmatprep.mubr.bf16.mxu0 %v1095_v0  ;;  %516 = vmatprep.mubr.bf16.mxu1 %v1095_v0  ;;  %v866_v3 = vld [vmem:[%s1254_s7 + $0xe0] ss:$16 sps:$4 sm:$0xff]   ;;  %v867_v4 = vld [vmem:[%s1254_s7 + $0xe8] ss:$16 sps:$4 sm:$0xff]   ;;  %v868_v5 = vld [vmem:[%s1254_s7 + $0xc4] ss:$16 sps:$4 sm:$0xff]  }
  0x4b   : > { %443 = vmatprep.subr.bf16.mxu0 %v862_v1  ;;  %484 = vmatprep.subr.bf16.mxu1 %v864_v2  ;;  %v870_v6 = vld [vmem:[%s1254_s7 + $0xcc] ss:$16 sps:$4 sm:$0xff]   ;;  %v872_v7 = vld [vmem:[%s1254_s7 + $0xc0] ss:$16 sps:$4 sm:$0xff]   ;;  %v873_v8 = vld [vmem:[%s1254_s7 + $0xc8] ss:$16 sps:$4 sm:$0xff]  }
  0x4c   : > { %444 = vmatpush1.bf16.msra.mxu0 %v866_v3  ;;  %485 = vmatpush1.bf16.msra.mxu1 %v867_v4  ;;  %v874_v9 = vld [vmem:[%s1254_s7 + $0xa4] ss:$16 sps:$4 sm:$0xff]   ;;  %v876_v10 = vld [vmem:[%s1254_s7 + $0xac] ss:$16 sps:$4 sm:$0xff]   ;;  %v878_v11 = vld [vmem:[%s1254_s7 + $0xa0] ss:$16 sps:$4 sm:$0xff]  }
  0x4d   : > { %445 = vmatprep.subr.bf16.mxu0 %v868_v5  ;;  %486 = vmatprep.subr.bf16.mxu1 %v870_v6  ;;  %v879_v12 = vld [vmem:[%s1254_s7 + $0xa8] ss:$16 sps:$4 sm:$0xff]   ;;  %v880_v13 = vld [vmem:[%s1254_s7 + $0x84] ss:$16 sps:$4 sm:$0xff]   ;;  %v882_v14 = vld [vmem:[%s1254_s7 + $0x8c] ss:$16 sps:$4 sm:$0xff]  }
  0x4e   : > { %v884_v15 = vld [vmem:[%s1254_s7 + $0x80] ss:$16 sps:$4 sm:$0xff]   ;;  %v885_v16 = vld [vmem:[%s1254_s7 + $0x88] ss:$16 sps:$4 sm:$0xff]   ;;  %v886_v17 = vld [vmem:[%s1254_s7 + $0x64] ss:$16 sps:$4 sm:$0xff]  }
  0x4f   : > { %v888_v18 = vld [vmem:[%s1254_s7 + $0x6c] ss:$16 sps:$4 sm:$0xff]   ;;  %v890_v19 = vld [vmem:[%s1254_s7 + $0x60] ss:$16 sps:$4 sm:$0xff]   ;;  %v891_v20 = vld [vmem:[%s1254_s7 + $0x68] ss:$16 sps:$4 sm:$0xff]  }
  0x50   : > { %446 = vmatpush1.bf16.msra.mxu0 %v872_v7  ;;  %487 = vmatpush1.bf16.msra.mxu1 %v873_v8  ;;  %v892_v21 = vld [vmem:[%s1254_s7 + $0x44] ss:$16 sps:$4 sm:$0xff]   ;;  %v894_v22 = vld [vmem:[%s1254_s7 + $0x4c] ss:$16 sps:$4 sm:$0xff]   ;;  %v896_v23 = vld [vmem:[%s1254_s7 + $0x40] ss:$16 sps:$4 sm:$0xff]  }
  0x51   : > { %447 = vmatprep.subr.bf16.mxu0 %v874_v9  ;;  %488 = vmatprep.subr.bf16.mxu1 %v876_v10  ;;  %v897_v24 = vld [vmem:[%s1254_s7 + $0x48] ss:$16 sps:$4 sm:$0xff]   ;;  %v898_v25 = vld [vmem:[%s1254_s7 + $0x24] ss:$16 sps:$4 sm:$0xff]   ;;  %v900_v26 = vld [vmem:[%s1254_s7 + $0x2c] ss:$16 sps:$4 sm:$0xff]  }
  0x52   : > { %v902_v27 = vld [vmem:[%s1254_s7 + $0x20] ss:$16 sps:$4 sm:$0xff]   ;;  %v903_v28 = vld [vmem:[%s1254_s7 + $0x28] ss:$16 sps:$4 sm:$0xff]   ;;  %v904_v29 = vld [vmem:[%s1254_s7 + $0x4] ss:$16 sps:$4 sm:$0xff]  }
  0x53   : > { %v906_v30 = vld [vmem:[%s1254_s7 + $0xc] ss:$16 sps:$4 sm:$0xff]   ;;  %v908_v31 = vld [vmem:[%s1254_s7] ss:$16 sps:$4 sm:$0xff]   ;;  %v909_v32 = vld [vmem:[%s1254_s7 + $0x8] ss:$16 sps:$4 sm:$0xff]  }
  0x54   : > { %448 = vmatpush1.bf16.msra.mxu0 %v878_v11  ;;  %489 = vmatpush1.bf16.msra.mxu1 %v879_v12  ;;  %v250_v33 = vld [vmem:[#allocation2] sm:$0xf]  ;;  %s745_s26 = sshll.u32 %s1250_s11, 5  ;;  %s746_s29 = sshll.u32 %s1250_s11, 3 }
  0x55   : > { %449 = vmatprep.subr.bf16.mxu0 %v880_v13  ;;  %490 = vmatprep.subr.bf16.mxu1 %v882_v14  ;;  %s790_s8 = sshll.u32 %s1145_s19, 9  ;;  %s232_s22 = scalar_lea.vmem [#allocation7], %s745_s26 }
  0x56   : > { %s566_s30 = sshll.u32 %s232_s22, 4  ;;  %s1298_s23 = scalar_lea.hbm %s1425_s2, %s790_s8  ;;  %s1300_s30 = int_to_ptr.vmem [resolvable:$true] %s566_s30 }
  0x57   : > { %s785_s10 = sshll.u32 %s1145_s19, 7  ;;  %s1306_s5 = scalar_lea.vmem [#allocation8], %s746_s29 }
  0x58   : > { %450 = vmatpush1.bf16.msra.mxu0 %v884_v15  ;;  %491 = vmatpush1.bf16.msra.mxu1 %v885_v16  ;;  %s579_s9 = sshll.u32 %s1306_s5, 4  ;;  %s542_s12 = scalar_lea.sflag [#allocation4], %s1250_s11  ;;  %s1344_s9 = int_to_ptr.vmem [resolvable:$true] %s579_s9 }
  0x59   : > { %451 = vmatprep.subr.bf16.mxu0 %v886_v17  ;;  %492 = vmatprep.subr.bf16.mxu1 %v888_v18  ;;  %s964_s13 = scalar_lea.vmem %s1300_s30, 512  ;;  %p1445_p3 = scmp.ne.s32.totalorder %s1435_s27, 0 }
  0x5a   : > { %p965_p13 = scmp.ne.s32.totalorder %s1300_s30, %s964_s13  ;;  %s1096_s7 = smov [#allocation7]  }
  0x5b   : > { %s968_s26 = sshll.u32 %s1096_s7, 4  ;;  %s969_s26 = int_to_ptr.vmem [resolvable:$false] %s968_s26 }
  0x5c   : > { %452 = vmatpush1.bf16.msra.mxu0 %v890_v19  ;;  %493 = vmatpush1.bf16.msra.mxu1 %v891_v20  ;;  %p966_p7 = pnand %p965_p13, %p1445_p3  ;;  %s970_s8 = scalar_lea.vmem %s969_s26, 1024 }
  0x5d   : > { %453 = vmatprep.subr.bf16.mxu0 %v892_v21  ;;  %494 = vmatprep.subr.bf16.mxu1 %v894_v22  ;;  %p971_p9 = scmp.lt.s32.totalorder %s1300_s30, %s969_s26  ;;  %p972_p10 = scmp.lt.s32.totalorder %s970_s8, %s964_s13 }
  0x5e   : > { %p967_p8 = pneg %p966_p7 }
  0x5f   : > { %p973_p2 = por %p972_p10, %p971_p9 }
  0x60   : > { %454 = vmatpush1.bf16.msra.mxu0 %v896_v23  ;;  %495 = vmatpush1.bf16.msra.mxu1 %v897_v24 }
  0x61   : > { %455 = vmatprep.subr.bf16.mxu0 %v898_v25  ;;  %496 = vmatprep.subr.bf16.mxu1 %v900_v26  ;;  %p974_p0 = pnand %p973_p2, %p967_p8 }
  0x64   : > { %456 = vmatpush1.bf16.msra.mxu0 %v902_v27  ;;  %497 = vmatpush1.bf16.msra.mxu1 %v903_v28 }
  0x65   : > { %457 = vmatprep.subr.bf16.mxu0 %v904_v29  ;;  %498 = vmatprep.subr.bf16.mxu1 %v906_v30 }
  0x68   : > { %458 = vmatpush1.bf16.msra.mxu0 %v908_v31  ;;  %499 = vmatpush1.bf16.msra.mxu1 %v909_v32 }
  0x6b   : > { %476 = vmatmul.mubr.bf16.vlgmr.msra.gmra.mxu0 %v250_v33  ;;  %517 = vmatmul.mubr.bf16.vlgmr.msra.gmra.mxu1 %v250_v33 }
 0x12b   : > { %v477_v34 = vpop.f32.mrf.mxu0  ;;  %v518_v35 = vpop.f32.mrf.mxu1 }
 0x12c   : > { %537 = vst [vmem:[%s232_s22] sm:$0xff] %v477_v34  ;;  %539 = vst [vmem:[%s232_s22 + $0x10] sm:$0xff] %v518_v35  ;;  %v525_v38 = vmul.f32 %v477_v34, %v477_v34  ;;  %v530_v39 = vmul.f32 %v518_v35, %v518_v35 }
 0x12d   : > { %v479_v36 = vpop.f32.mrf.mxu0  ;;  %v520_v37 = vpop.f32.mrf.mxu1 }
 0x12e   : > { %v526_v40 = vadd.f32 %v479_v36, %v477_v34  ;;  %v527_v41 = vmul.f32 %v479_v36, %v479_v36  ;;  %538 = vst [vmem:[%s232_s22 + $0x8] sm:$0xff] %v479_v36  ;;  %540 = vst [vmem:[%s232_s22 + $0x18] sm:$0xff] %v520_v37 }
 0x12f   : > { %v481_v42 = vpop.f32.mrf.mxu0  ;;  %v522_v43 = vpop.f32.mrf.mxu1 }
 0x130   : > { %977 = shalt.err (!%p974_p0)
}
 0x131   : > { %s978_s22 = scalar_lea.hbm %s1298_s23, 512  ;;  %s982_s7 = scalar_lea.hbm %s1425_s2, 1024 }
 0x132   : > { %p979_p4 = scmp.ne.s32.totalorder %s1298_s23, %s978_s22  ;;  %p983_p12 = scmp.lt.s32.totalorder %s1298_s23, %s1425_s2 }
 0x133   : > { %p984_p1 = scmp.lt.s32.totalorder %s982_s7, %s978_s22 }
 0x134   : > { %p980_p11 = pnand %p979_p4, %p1445_p3 }
 0x135   : > { %p985_p6 = por %p984_p1, %p983_p12 }
 0x136   : > { %p981_p5 = pneg %p980_p11 }
 0x138   : > { %p986_p13 = pnand %p985_p6, %p981_p5 }
 0x13a   : > { %989 = shalt.err (!%p986_p13)
}
 0x13b   : > { %797 = dma.vmem_to_hbm [thread:$0]  (%p1445_p3), %s1300_s30, 512, %s1298_s23, %s542_s12   ;;  %v528_v44 = vadd.f32 %v527_v41, %v525_v38  ;;  %v529_v45 = vadd.f32 %v526_v40, %v518_v35  ;;  %v482_v46 = vpop.f32.mrf.mxu0  ;;  %v523_v47 = vpop.f32.mrf.mxu1  ;;  %v533_v50 = vmul.f32 %v520_v37, %v520_v37 }
 0x13c   : > { %s1332_s20 = scalar_lea.vmem [#allocation10], %s746_s29  ;;  %s1340_s8 = scalar_lea.hbm %s1426_s3, %s785_s10 }
 0x13d   : > { %s592_s25 = sshll.u32 %s1332_s20, 4  ;;  %v531_v48 = vadd.f32 %v530_v39, %v528_v44  ;;  %v532_v49 = vadd.f32 %v529_v45, %v520_v37  ;;  %s1352_s30 = scalar_lea.hbm %s1427_s4, %s785_s10  ;;  %s1354_s25 = int_to_ptr.vmem [resolvable:$true] %s592_s25 }
 0x13e   : > { %s1446_s23 = sand.u32 1, %s1145_s19   ;;  %s990_s22 = scalar_lea.vmem %s1344_s9, 128 }
 0x13f   : > { %v534_v51 = vadd.f32 %v533_v50, %v531_v48  ;;  %535 = vst [vmem:[%s1306_s5] sm:$0xff] %v532_v49  ;;  %s1358_s12 = scalar_lea.sflag [#allocation9], %s1446_s23  ;;  %p991_p7 = scmp.ne.s32.totalorder %s1344_s9, %s990_s22 }
 0x140   : > { %s1097_s6 = smov [#allocation8]  }
 0x141   : > { %p992_p8 = pnand %p991_p7, %p1445_p3  ;;  %s994_s14 = sshll.u32 %s1097_s6, 4  ;;  %s995_s14 = int_to_ptr.vmem [resolvable:$false] %s994_s14 }
 0x142   : > { %s996_s5 = scalar_lea.vmem %s995_s14, 256  ;;  %p997_p10 = scmp.lt.s32.totalorder %s1344_s9, %s995_s14 }
 0x143   : > { %p993_p9 = pneg %p992_p8  ;;  %p998_p2 = scmp.lt.s32.totalorder %s996_s5, %s990_s22 }
 0x145   : > { %p999_p0 = por %p998_p2, %p997_p10 }
 0x147   : > { %p1000_p4 = pnand %p999_p0, %p993_p9 }
 0x149   : > { %1003 = shalt.err (!%p1000_p4)
}
 0x14a   : > { %s1004_s19 = scalar_lea.hbm %s1340_s8, 128  ;;  %s1008_s13 = scalar_lea.hbm %s1426_s3, 256 }
 0x14b   : > { %p1005_p11 = scmp.ne.s32.totalorder %s1340_s8, %s1004_s19  ;;  %p1009_p1 = scmp.lt.s32.totalorder %s1340_s8, %s1426_s3 }
 0x14c   : > { %p1010_p6 = scmp.lt.s32.totalorder %s1008_s13, %s1004_s19 }
 0x14d   : > { %p1006_p5 = pnand %p1005_p11, %p1445_p3 }
 0x14e   : > { %p1011_p13 = por %p1010_p6, %p1009_p1 }
 0x14f   : > { %p1007_p12 = pneg %p1006_p5 }
 0x151   : > { %p1012_p7 = pnand %p1011_p13, %p1007_p12 }
 0x153   : > { %1015 = shalt.err (!%p1012_p7)
}
 0x154   : > { %798 = dma.vmem_to_hbm [thread:$0]  (%p1445_p3), %s1344_s9, 128, %s1340_s8, %s1358_s12   ;;  %536 = vst [vmem:[%s1332_s20] sm:$0xff] %v534_v51 }
 0x155   : > { %s1016_s29 = scalar_lea.vmem %s1354_s25, 128  ;;  %s1098_s23 = smov [#allocation10]  }
 0x156   : > { %p1017_p8 = scmp.ne.s32.totalorder %s1354_s25, %s1016_s29  ;;  %s1020_s22 = sshll.u32 %s1098_s23, 4  ;;  %s1021_s22 = int_to_ptr.vmem [resolvable:$false] %s1020_s22 }
 0x157   : > { %s1022_s6 = scalar_lea.vmem %s1021_s22, 256  ;;  %p1023_p2 = scmp.lt.s32.totalorder %s1354_s25, %s1021_s22 }
 0x158   : > { %p1018_p9 = pnand %p1017_p8, %p1445_p3  ;;  %p1024_p0 = scmp.lt.s32.totalorder %s1022_s6, %s1016_s29 }
 0x15a   : > { %p1019_p10 = pneg %p1018_p9  ;;  %p1025_p4 = por %p1024_p0, %p1023_p2 }
 0x15c   : > { %p1026_p11 = pnand %p1025_p4, %p1019_p10 }
 0x15e   : > { %1029 = shalt.err (!%p1026_p11)
}
 0x15f   : > { %s1030_s9 = scalar_lea.hbm %s1352_s30, 128  ;;  %s1034_s14 = scalar_lea.hbm %s1427_s4, 256 }
 0x160   : > { %p1031_p5 = scmp.ne.s32.totalorder %s1352_s30, %s1030_s9  ;;  %p1035_p6 = scmp.lt.s32.totalorder %s1352_s30, %s1427_s4 }
 0x161   : > { %p1036_p13 = scmp.lt.s32.totalorder %s1034_s14, %s1030_s9 }
 0x162   : > { %p1032_p12 = pnand %p1031_p5, %p1445_p3 }
 0x163   : > { %p1037_p7 = por %p1036_p13, %p1035_p6 }
 0x164   : > { %p1033_p1 = pneg %p1032_p12 }
 0x166   : > { %p1038_p8 = pnand %p1037_p7, %p1033_p1 }
 0x168   : > { %1041 = shalt.err (!%p1038_p8)
}
 0x169   : > { %799 = dma.vmem_to_hbm [thread:$0]  (%p1445_p3), %s1354_s25, 128, %s1352_s30, %s1358_s12  }
 0x16a PF: > { %s604_s10 = sand.u32 1, %s1076_s15   ;;  %p1447_p9 = scmp.ne.s32.totalorder %s1436_s28, 0 }
 0x16b   : > { %p1448_p10 = scmp.ge.s32.totalorder %s1088_s18, 2  ;;  %s605_s7 = scalar_lea.sflag [#allocation4], %s604_s10 }
 0x16d   : > { %p812_p2 = pnand %p1448_p10, %p1447_p9 }
 0x16f   : > { %p813_p0 = pneg %p812_p2 }
 0x171   : > { %1067 = dma.done.wait (%p813_p0), %s605_s7, 512  }
 0x172   : > { %1069 = vsyncadd (%p813_p0), %s605_s7, 4294966784  ;;  %s1449_s13 = sadd.s32 4294967294, %s1088_s18  }
 0x173   : > { %s613_s26 = sand.u32 1, %s1449_s13  }
 0x174   : > { %s614_s27 = scalar_lea.sflag [#allocation9], %s613_s26 }
 0x175   : > { %1071 = dma.done.wait (%p813_p0), %s614_s27, 256  }
 0x176   : > { %1073 = vsyncadd (%p813_p0), %s614_s27, 4294967040  ;;  %p22_p3 = scmp.ge.s32.totalorder %s1149_s21, 4   ;;  %s1450_s15 = smov %s1080_s16 }
 0x177   : > { %s1451_s16 = smov %s1084_s17  ;;  %s1452_s17 = smov %s1161_s24 }
 0x178   : > { %s1453_s18 = smov %s1149_s21  ;;  %24 = sbr.rel (!%p22_p3) target bundleno = 8 (0x8), region = 110 }
 0x17d   :  { %628 = vsyncpa [#allocation3], 1 }
 0x17e   :  { %630 = vsyncpa [#allocation3 + $0x1], 1 }
 0x17f   :  { %631 = vsyncpa [#allocation6], 1 }
 0x180   :  { %633 = vsyncpa [#allocation6 + $0x1], 1 }
 0x181   :  { %634 = vsyncpa [#allocation4], 1 }
 0x182   :  { %636 = vsyncpa [#allocation4 + $0x1], 1 }
 0x183   :  { %637 = vsyncpa [#allocation9], 1 }
 0x184   :  { %639 = vsyncpa [#allocation9 + $0x1], 1 }

</bundles_post_ra>
